<compile_context>
chip_gen: v5e
topology: v5e:2x2
jax: 0.10.0
libtpu: 0.0.40
codegen_flags: <defaults>
</compile_context>

<pallas_src>
import jax
import jax.numpy as jnp
from jax.experimental import pallas as pl
from jax.experimental.pallas import tpu as pltpu


def _outconv_kernel(x_ref, w_ref, b_ref, o_ref):
    # x_ref: (Cin, T)  VMEM   -- pixels on lanes, channels on sublanes
    # w_ref: (Cout, Cin) SMEM -- scalar weights
    # b_ref: (Cout,)     SMEM -- scalar bias
    # o_ref: (Cout, T) VMEM
    cout, cin = w_ref.shape

    # Load each input-channel row once (lane-dense (1, T) vectors).
    xs = [x_ref[ci:ci + 1, :].astype(jnp.float32) for ci in range(cin)]

    # Per output channel: bias + sum of scalar * vector FMAs (pure VPU work).
    for co in range(cout):
        acc = xs[0] * w_ref[co, 0] + b_ref[co]
        for ci in range(1, cin):
            acc = acc + xs[ci] * w_ref[co, ci]
        o_ref[co:co + 1, :] = acc.astype(o_ref.dtype)


def out_conv(x_nchw, weight, bias, *, tile_px=8192):
    """1x1 Conv2d forward, matching torch.nn.Conv2d(in, out, kernel_size=1).

    x_nchw: (N, Cin, H, W)
    weight: (Cout, Cin, 1, 1)  (PyTorch layout)
    bias:   (Cout,)
    returns (N, Cout, H, W)
    """
    N, Cin, H, W = x_nchw.shape
    Cout = weight.shape[0]
    HW = H * W

    # Glue: pure reshapes only (no transposes, no padding copies).
    x_flat = x_nchw.reshape(N, Cin, HW)                       # (N, Cin, HW)
    w_mat = weight.reshape(Cout, Cin).astype(jnp.float32)     # (Cout, Cin) scalars
    b_vec = bias.reshape(Cout).astype(jnp.float32)            # (Cout,)     scalars

    # Pixel tile: full HW if it fits, else a lane-aligned (multiple-of-128) tile.
    if HW <= tile_px:
        T = HW
    else:
        T = max(128, (tile_px // 128) * 128)
    grid = (N, pl.cdiv(HW, T))   # ragged last tile handled by Pallas masking

    out_flat = pl.pallas_call(
        _outconv_kernel,
        out_shape=jax.ShapeDtypeStruct((N, Cout, HW), x_nchw.dtype),
        grid_spec=pltpu.PrefetchScalarGridSpec(
            num_scalar_prefetch=0,
            grid=grid,
            in_specs=[
                # x tile: squeeze batch dim, full channel dim, T pixels on lanes.
                pl.BlockSpec((None, Cin, T), lambda n, t: (n, 0, t)),
                # Weights / bias: small scalar tables, resident in SMEM for the
                # whole grid (no per-step DMA).
                pl.BlockSpec(memory_space=pltpu.MemorySpace.SMEM),
                pl.BlockSpec(memory_space=pltpu.MemorySpace.SMEM),
            ],
            out_specs=pl.BlockSpec((None, Cout, T), lambda n, t: (n, 0, t)),
        ),
        compiler_params=pltpu.CompilerParams(
            # Both axes independent -> shard across v7x's 2 TensorCores;
            # no-op on single-core v5e/v6e.
            dimension_semantics=("parallel", "parallel")),
    )(x_flat, w_mat, b_vec)

    # Glue back: pure reshape, no transpose.
    return out_flat.reshape(N, Cout, H, W)


if __name__ == "__main__":
    # Shapes consistent with OutConv(in_channels=4, out_channels=3) on a
    # small U-Net feature map.
    N, Cin, H, W = 2, 4, 16, 16
    Cout = 3

    key = jax.random.PRNGKey(0)
    kx, kw, kb = jax.random.split(key, 3)

    x = jax.random.normal(kx, (N, Cin, H, W), dtype=jnp.float32)

    # Deterministic parameter init mimicking PyTorch Conv2d defaults
    # (uniform in +/- 1/sqrt(fan_in), fan_in = Cin * 1 * 1).
    bound = 1.0 / jnp.sqrt(jnp.float32(Cin))
    weight = jax.random.uniform(kw, (Cout, Cin, 1, 1), jnp.float32,
                                minval=-bound, maxval=bound)
    bias = jax.random.uniform(kb, (Cout,), jnp.float32,
                              minval=-bound, maxval=bound)

    y = out_conv(x, weight, bias)
    y = jax.block_until_ready(y)

    # Reference check against plain-JAX 1x1 conv semantics.
    ref = jnp.einsum("nchw,oc->nohw", x, weight.reshape(Cout, Cin)) \
        + bias.reshape(1, Cout, 1, 1)
    assert y.shape == (N, Cout, H, W)
    assert jnp.allclose(y, ref, atol=1e-5, rtol=1e-5)

    print("KERNEL_OK")
</pallas_src>

<mosaic_0001>
module attributes {stable_mosaic.version = 11 : i64} {
  func.func @_outconv_kernel(%arg0: i32, %arg1: i32, %arg2: memref<1x4x256xf32, #tpu.memory_space<vmem>>, %arg3: memref<3x4xf32, #tpu.memory_space<smem>>, %arg4: memref<3xf32, #tpu.memory_space<smem>>, %arg5: memref<1x3x256xf32, #tpu.memory_space<vmem>>) attributes {dimension_semantics = [#tpu.dimension_semantics<parallel>, #tpu.dimension_semantics<parallel>], iteration_bounds = array<i64: 2, 1>, scalar_prefetch = 0 : i64, scratch_operands = 0 : i64, tpu.core_type = #tpu.core_type<tc>, window_params = [{transform_indices = @transform_0, window_bounds = array<i64: 1, 4, 256>}, {transform_indices = @transform_1, window_bounds = array<i64: 3, 4>}, {transform_indices = @transform_2, window_bounds = array<i64: 3>}, {transform_indices = @transform_3, window_bounds = array<i64: 1, 3, 256>}]} {
    %c0 = arith.constant 0 : index
    %c0_0 = arith.constant 0 : index
    %c0_1 = arith.constant 0 : index
    %0 = vector.load %arg2[%c0, %c0_0, %c0_1] : memref<1x4x256xf32, #tpu.memory_space<vmem>>, vector<1x1x256xf32>
    %1 = vector.shape_cast %0 : vector<1x1x256xf32> to vector<1x256xf32>
    %c0_2 = arith.constant 0 : index
    %c1 = arith.constant 1 : index
    %c0_3 = arith.constant 0 : index
    %2 = vector.load %arg2[%c0_2, %c1, %c0_3] : memref<1x4x256xf32, #tpu.memory_space<vmem>>, vector<1x1x256xf32>
    %3 = vector.shape_cast %2 : vector<1x1x256xf32> to vector<1x256xf32>
    %c0_4 = arith.constant 0 : index
    %c2 = arith.constant 2 : index
    %c0_5 = arith.constant 0 : index
    %4 = vector.load %arg2[%c0_4, %c2, %c0_5] : memref<1x4x256xf32, #tpu.memory_space<vmem>>, vector<1x1x256xf32>
    %5 = vector.shape_cast %4 : vector<1x1x256xf32> to vector<1x256xf32>
    %c0_6 = arith.constant 0 : index
    %c3 = arith.constant 3 : index
    %c0_7 = arith.constant 0 : index
    %6 = vector.load %arg2[%c0_6, %c3, %c0_7] : memref<1x4x256xf32, #tpu.memory_space<vmem>>, vector<1x1x256xf32>
    %7 = vector.shape_cast %6 : vector<1x1x256xf32> to vector<1x256xf32>
    %c0_8 = arith.constant 0 : index
    %c0_9 = arith.constant 0 : index
    %8 = memref.load %arg3[%c0_8, %c0_9] : memref<3x4xf32, #tpu.memory_space<smem>>
    %9 = vector.broadcast %8 : f32 to vector<1x256xf32>
    %10 = arith.mulf %1, %9 : vector<1x256xf32>
    %c0_10 = arith.constant 0 : index
    %11 = memref.load %arg4[%c0_10] : memref<3xf32, #tpu.memory_space<smem>>
    %12 = vector.broadcast %11 : f32 to vector<1x256xf32>
    %13 = arith.addf %10, %12 : vector<1x256xf32>
    %c0_11 = arith.constant 0 : index
    %c1_12 = arith.constant 1 : index
    %14 = memref.load %arg3[%c0_11, %c1_12] : memref<3x4xf32, #tpu.memory_space<smem>>
    %15 = vector.broadcast %14 : f32 to vector<1x256xf32>
    %16 = arith.mulf %3, %15 : vector<1x256xf32>
    %17 = arith.addf %13, %16 : vector<1x256xf32>
    %c0_13 = arith.constant 0 : index
    %c2_14 = arith.constant 2 : index
    %18 = memref.load %arg3[%c0_13, %c2_14] : memref<3x4xf32, #tpu.memory_space<smem>>
    %19 = vector.broadcast %18 : f32 to vector<1x256xf32>
    %20 = arith.mulf %5, %19 : vector<1x256xf32>
    %21 = arith.addf %17, %20 : vector<1x256xf32>
    %c0_15 = arith.constant 0 : index
    %c3_16 = arith.constant 3 : index
    %22 = memref.load %arg3[%c0_15, %c3_16] : memref<3x4xf32, #tpu.memory_space<smem>>
    %23 = vector.broadcast %22 : f32 to vector<1x256xf32>
    %24 = arith.mulf %7, %23 : vector<1x256xf32>
    %25 = arith.addf %21, %24 : vector<1x256xf32>
    %c0_17 = arith.constant 0 : index
    %c0_18 = arith.constant 0 : index
    %c0_19 = arith.constant 0 : index
    %26 = vector.load %arg5[%c0_17, %c0_18, %c0_19] : memref<1x3x256xf32, #tpu.memory_space<vmem>>, vector<1x1x256xf32>
    %27 = vector.shape_cast %26 : vector<1x1x256xf32> to vector<1x256xf32>
    %28 = vector.shape_cast %25 : vector<1x256xf32> to vector<1x1x256xf32>
    tpu.vector_store %arg5[%c0_17, %c0_18, %c0_19], %28 {strides = array<i32>} : memref<1x3x256xf32, #tpu.memory_space<vmem>>, vector<1x1x256xf32>,
    %c1_20 = arith.constant 1 : index
    %c0_21 = arith.constant 0 : index
    %29 = memref.load %arg3[%c1_20, %c0_21] : memref<3x4xf32, #tpu.memory_space<smem>>
    %30 = vector.broadcast %29 : f32 to vector<1x256xf32>
    %31 = arith.mulf %1, %30 : vector<1x256xf32>
    %c1_22 = arith.constant 1 : index
    %32 = memref.load %arg4[%c1_22] : memref<3xf32, #tpu.memory_space<smem>>
    %33 = vector.broadcast %32 : f32 to vector<1x256xf32>
    %34 = arith.addf %31, %33 : vector<1x256xf32>
    %c1_23 = arith.constant 1 : index
    %c1_24 = arith.constant 1 : index
    %35 = memref.load %arg3[%c1_23, %c1_24] : memref<3x4xf32, #tpu.memory_space<smem>>
    %36 = vector.broadcast %35 : f32 to vector<1x256xf32>
    %37 = arith.mulf %3, %36 : vector<1x256xf32>
    %38 = arith.addf %34, %37 : vector<1x256xf32>
    %c1_25 = arith.constant 1 : index
    %c2_26 = arith.constant 2 : index
    %39 = memref.load %arg3[%c1_25, %c2_26] : memref<3x4xf32, #tpu.memory_space<smem>>
    %40 = vector.broadcast %39 : f32 to vector<1x256xf32>
    %41 = arith.mulf %5, %40 : vector<1x256xf32>
    %42 = arith.addf %38, %41 : vector<1x256xf32>
    %c1_27 = arith.constant 1 : index
    %c3_28 = arith.constant 3 : index
    %43 = memref.load %arg3[%c1_27, %c3_28] : memref<3x4xf32, #tpu.memory_space<smem>>
    %44 = vector.broadcast %43 : f32 to vector<1x256xf32>
    %45 = arith.mulf %7, %44 : vector<1x256xf32>
    %46 = arith.addf %42, %45 : vector<1x256xf32>
    %c0_29 = arith.constant 0 : index
    %c1_30 = arith.constant 1 : index
    %c0_31 = arith.constant 0 : index
    %47 = vector.load %arg5[%c0_29, %c1_30, %c0_31] : memref<1x3x256xf32, #tpu.memory_space<vmem>>, vector<1x1x256xf32>
    %48 = vector.shape_cast %47 : vector<1x1x256xf32> to vector<1x256xf32>
    %49 = vector.shape_cast %46 : vector<1x256xf32> to vector<1x1x256xf32>
    tpu.vector_store %arg5[%c0_29, %c1_30, %c0_31], %49 {strides = array<i32>} : memref<1x3x256xf32, #tpu.memory_space<vmem>>, vector<1x1x256xf32>,
    %c2_32 = arith.constant 2 : index
    %c0_33 = arith.constant 0 : index
    %50 = memref.load %arg3[%c2_32, %c0_33] : memref<3x4xf32, #tpu.memory_space<smem>>
    %51 = vector.broadcast %50 : f32 to vector<1x256xf32>
    %52 = arith.mulf %1, %51 : vector<1x256xf32>
    %c2_34 = arith.constant 2 : index
    %53 = memref.load %arg4[%c2_34] : memref<3xf32, #tpu.memory_space<smem>>
    %54 = vector.broadcast %53 : f32 to vector<1x256xf32>
    %55 = arith.addf %52, %54 : vector<1x256xf32>
    %c2_35 = arith.constant 2 : index
    %c1_36 = arith.constant 1 : index
    %56 = memref.load %arg3[%c2_35, %c1_36] : memref<3x4xf32, #tpu.memory_space<smem>>
    %57 = vector.broadcast %56 : f32 to vector<1x256xf32>
    %58 = arith.mulf %3, %57 : vector<1x256xf32>
    %59 = arith.addf %55, %58 : vector<1x256xf32>
    %c2_37 = arith.constant 2 : index
    %c2_38 = arith.constant 2 : index
    %60 = memref.load %arg3[%c2_37, %c2_38] : memref<3x4xf32, #tpu.memory_space<smem>>
    %61 = vector.broadcast %60 : f32 to vector<1x256xf32>
    %62 = arith.mulf %5, %61 : vector<1x256xf32>
    %63 = arith.addf %59, %62 : vector<1x256xf32>
    %c2_39 = arith.constant 2 : index
    %c3_40 = arith.constant 3 : index
    %64 = memref.load %arg3[%c2_39, %c3_40] : memref<3x4xf32, #tpu.memory_space<smem>>
    %65 = vector.broadcast %64 : f32 to vector<1x256xf32>
    %66 = arith.mulf %7, %65 : vector<1x256xf32>
    %67 = arith.addf %63, %66 : vector<1x256xf32>
    %c0_41 = arith.constant 0 : index
    %c2_42 = arith.constant 2 : index
    %c0_43 = arith.constant 0 : index
    %68 = vector.load %arg5[%c0_41, %c2_42, %c0_43] : memref<1x3x256xf32, #tpu.memory_space<vmem>>, vector<1x1x256xf32>
    %69 = vector.shape_cast %68 : vector<1x1x256xf32> to vector<1x256xf32>
    %70 = vector.shape_cast %67 : vector<1x256xf32> to vector<1x1x256xf32>
    tpu.vector_store %arg5[%c0_41, %c2_42, %c0_43], %70 {strides = array<i32>} : memref<1x3x256xf32, #tpu.memory_space<vmem>>, vector<1x1x256xf32>,
    return
  }
  func.func @transform_0(%arg0: i32, %arg1: i32) -> (i32, i32, i32) {
    %c0_i32 = arith.constant 0 : i32
    %c0_i32_0 = arith.constant 0 : i32
    return %arg0, %c0_i32, %arg1 : i32, i32, i32
  }
  func.func @transform_1(%arg0: i32, %arg1: i32) -> (i32, i32) {
    %c0_i32 = arith.constant 0 : i32
    %c0_i32_0 = arith.constant 0 : i32
    %c0_i32_1 = arith.constant 0 : i32
    return %c0_i32, %c0_i32_0 : i32, i32
  }
  func.func @transform_2(%arg0: i32, %arg1: i32) -> i32 {
    %c0_i32 = arith.constant 0 : i32
    %c0_i32_0 = arith.constant 0 : i32
    return %c0_i32 : i32
  }
  func.func @transform_3(%arg0: i32, %arg1: i32) -> (i32, i32, i32) {
    %c0_i32 = arith.constant 0 : i32
    %c0_i32_0 = arith.constant 0 : i32
    return %arg0, %c0_i32, %arg1 : i32, i32, i32
  }
}

</mosaic_0001>

<bundles_post_ra>
// kernel: tpu_custom_call.1
= control target key start
LH: loop header
LB: loop body
LE: loop exit
PB: predicated region body
PF: predicated region fallthrough
CT: control target
= control target key end

     0   :  { %8 = vsyncpa [#allocation3], 0  ;;  %s823_s0 = inlined_call_operand.hbm [shape: f32[2,4,256], index: 0, kind: input, shape index: {}]   ;;  %s824_s1 = inlined_call_operand.hbm [shape: f32[3,4], index: 1, kind: input, shape index: {}]   ;;  %s825_s2 = inlined_call_operand.vmem [shape: f32[3], index: 2, kind: input, shape index: {}]   ;;  %s826_s3 = inlined_call_operand.vmem [shape: f32[2,3,256], index: 3, kind: output, shape index: {}]  }
   0x1   :  { %10 = vsyncpa [#allocation3 + $0x1], 0 }
   0x2   :  { %11 = vsyncpa [#allocation4], 0 }
   0x3   :  { %12 = vsyncpa [#allocation5], 0  ;;  %s690_s12 = smov 0   ;;  %s692_s13 = smov 0  }
   0x4   :  { %s694_s14 = smov 0   ;;  %s696_s15 = smov 0  }
   0x5   :  { %s698_s16 = smov 0   ;;  %s700_s17 = smov 0  }
   0x6 LB: > { %s435_s18 = sadd.s32 4294967295, %s666_s17   ;;  %p52_p0 = scmp.ne.s32.totalorder %s650_s13, %s646_s12  ;;  %s666_s17 = sphi %s700_s17, %s18_s17   ;;  %s662_s16 = sphi %s698_s16, %s837_s16   ;;  %s658_s15 = sphi %s696_s15, %s836_s15   ;;  %s654_s14 = sphi %s694_s14, %s835_s14   ;;  %s650_s13 = sphi %s692_s13, %s834_s13   ;;  %s646_s12 = sphi %s690_s12, %s833_s12  }
   0x7   : > { %p720_p1 = scmp.eq.s32.totalorder %s435_s18, 0  ;;  %p437_p2 = scmp.ge.s32.totalorder %s666_s17, 1 }
   0x8   : > { %p133_p3 = scmp.lt.s32.totalorder %s666_s17, 3  ;;  %s145_s23 = sshll.u32 %s824_s1, 4  ;;  %s146_s23 = int_to_ptr.hbm [resolvable:$true] %s145_s23 }
   0x9   : > { %p728_p4 = por %p720_p1, %p52_p0  ;;  %s155_s27 = sshll.u32 %s825_s2, 4  ;;  %s156_s27 = int_to_ptr.vmem [resolvable:$true] %s155_s27 }
   0xa   : > { %p735_p5 = pnand %p437_p2, %p133_p3  ;;  %s668_s28 = smov [#allocation6]  }
   0xb   : > { %s669_s29 = smov [#allocation7]   ;;  %s30_s30 = sadd.s32 1, %s662_s16 }
   0xc   : > { %p482_p6 = pneg %p735_p5  ;;  %s39_s4 = sadd.s32 1, %s654_s14 }
   0xd   : > { %p32_p8 = scmp.ge.s32.totalorder %s30_s30, 2  ;;  %p46_p9 = scmp.ne.s32.totalorder %s654_s14, %s650_s13 }
   0xe   : > { %p483_p7 = pnand %p482_p6, %p720_p1  ;;  %p47_p10 = scmp.eq.s32.totalorder %s666_s17, 0 }
   0xf   : > { %p495_p11 = scmp.lt.s32.totalorder %s666_s17, 2  ;;  %s839_s30 = smov (%p32_p8, %s30_s30), 0 }
  0x10   : > { %485 = dma.hbm_to_smem (!%p483_p7), %s146_s23, 64, %s668_s28, [#allocation4]  }
  0x11   : > { %488 = dma.vmem_to_smem (!%p483_p7), %s156_s27, 16, %s669_s29, [#allocation5]  }
  0x12   : > { %p754_p12 = por %p47_p10, %p46_p9  ;;  %s166_s6 = sand.u32 1, %s654_s14  }
  0x13   : > { %s34_s7 = ssub.s32 %s662_s16, %s839_s30  ;;  %s441_s8 = sshll.u32 %s166_s6, 3 }
  0x14   : > { %p37_p13 = scmp.eq.s32.totalorder %s34_s7, 0  ;;  %s470_s9 = sshll.u32 %s662_s16, 3 }
  0x15   : > { %s177_s18 = scalar_lea.hbm %s823_s0, %s470_s9  ;;  %s170_s21 = scalar_lea.vmem [#allocation2], %s441_s8 }
  0x16   : > { %s763_s10 = scalar_select %p37_p13, %s654_s14, %s39_s4  }
  0x17   : > { %s181_s22 = sshll.u32 %s170_s21, 4  ;;  %s179_s23 = sshll.u32 %s177_s18, 4  ;;  %s182_s22 = int_to_ptr.vmem [resolvable:$true] %s181_s22  ;;  %s180_s23 = int_to_ptr.hbm [resolvable:$true] %s179_s23 }
  0x18   : > { %p490_p0 = pnand %p495_p11, %p754_p12  ;;  %s167_s25 = scalar_lea.sflag [#allocation3], %s166_s6 }
  0x19   : > { %190 = sbr.rel (%p735_p5) target bundleno = 65 (0x41), region = 32  ;;  %s192_s26 = sand.u32 (!%p735_p5), 1, %s650_s13  }
  0x1a   : > { %492 = dma.hbm_to_vmem [thread:$0]  (!%p490_p0), %s180_s23, 128, %s182_s22, %s167_s25  }
  0x1b   : > { %s445_s27 = sshll.u32 (!%p735_p5), %s192_s26, 3  ;;  %s193_s28 = scalar_lea.sflag (!%p735_p5), [#allocation3], %s192_s26 }
  0x1c   : > { %s196_s29 = scalar_lea.vmem (!%p735_p5), [#allocation2], %s445_s27 }
  0x1e   : > { %633 = dma.done.wait (%p728_p4), %s193_s28, 128  }
  0x1f   : > { %635 = vsyncadd (%p728_p4), %s193_s28, 4294967168 }
  0x20   : > { %637 = dma.done.wait (%p720_p1), [#allocation4], 64  }
  0x21   : > { %639 = vsyncadd (%p720_p1), [#allocation4], 4294967232 }
  0x22   : > { %641 = dma.done.wait (%p720_p1), [#allocation5], 16  }
  0x23   : > { %643 = vsyncadd (%p720_p1), [#allocation5], 4294967280 }
  0x24   : > { %212 = sfence }
  0x25   : > { %p237_p2 = scmp.lt.s32.totalorder %s658_s15, 1  ;;  %s253_s24 = sld [smem:[#allocation6]]  ;;  %v246_v0 = vld [vmem:[%s196_s29] ss:$4 sm:$0x3]  ;;  %v271_v13 = vlaneseq }
  0x26   : > { %s256_s20 = sld [smem:[#allocation7]]  ;;  %v450_v3 = vld [vmem:[%s196_s29 + $0x1] ss:$4 sm:$0x3] }
  0x27   : > { %s841_s15 = smov (!%p237_p2, %s658_s15), 1  ;;  %s453_s4 = sld [smem:[#allocation6 + $0x1]]  ;;  %v451_v4 = vld [vmem:[%s196_s29 + $0x2] ss:$4 sm:$0x3]  ;;  %vm795_vm0 = vcmp.lt.s32.totalorder %v271_v13, 256 }
  0x28   : > { %s454_s5 = sld [smem:[#allocation6 + $0x2]]  ;;  %v452_v6 = vld [vmem:[%s196_s29 + $0x3] ss:$4 sm:$0x3]  ;;  %s471_s18 = sshll.u32 %s841_s15, 3 }
  0x29   : > { %s455_s6 = sld [smem:[#allocation6 + $0x3]]  ;;  %s244_s27 = scalar_lea.vmem %s826_s3, %s471_s18 }
  0x2a   : > { %s456_s7 = sld [smem:[#allocation6 + $0x80]] }
  0x2b   : > { %v254_v1 = vstv %s253_s24  ;;  %s457_s8 = sld [smem:[#allocation7 + $0x1]] }
  0x2c   : > { %v255_v2 = vmul.f32 %v254_v1, %v246_v0  ;;  %v257_v5 = vstv %s256_s20  ;;  %s458_s19 = sld [smem:[#allocation6 + $0x81]] }
  0x2d   : > { %v260_v8 = vstv %s453_s4  ;;  %s459_s9 = sld [smem:[#allocation6 + $0x82]] }
  0x2e   : > { %v258_v7 = vadd.f32 %v257_v5, %v255_v2  ;;  %v261_v9 = vmul.f32 %v450_v3, %v260_v8  ;;  %v264_v10 = vstv %s454_s5  ;;  %s460_s11 = sld [smem:[#allocation6 + $0x83]] }
  0x2f   : > { %v265_v11 = vmul.f32 %v451_v4, %v264_v10  ;;  %v268_v12 = vstv %s455_s6  ;;  %s462_s12 = sld [smem:[#allocation6 + $0x100]] }
  0x30   : > { %v262_v14 = vadd.f32 %v261_v9, %v258_v7  ;;  %v269_v15 = vmul.f32 %v452_v6, %v268_v12  ;;  %v277_v16 = vstv %s456_s7  ;;  %s463_s21 = sld [smem:[#allocation7 + $0x2]] }
  0x31   : > { %v278_v17 = vmul.f32 %v277_v16, %v246_v0  ;;  %v280_v18 = vstv %s457_s8  ;;  %s464_s22 = sld [smem:[#allocation6 + $0x101]] }
  0x32   : > { %v266_v19 = vadd.f32 %v265_v11, %v262_v14  ;;  %v283_v20 = vstv %s458_s19  ;;  %s465_s23 = sld [smem:[#allocation6 + $0x102]] }
  0x33   : > { %v281_v22 = vadd.f32 %v280_v18, %v278_v17  ;;  %v284_v23 = vmul.f32 %v450_v3, %v283_v20  ;;  %v287_v24 = vstv %s459_s9  ;;  %s466_s15 = sld [smem:[#allocation6 + $0x103]] }
  0x34   : > { %v270_v25 = vadd.f32 %v269_v15, %v266_v19  ;;  %v288_v26 = vmul.f32 %v451_v4, %v287_v24  ;;  %v291_v27 = vstv %s460_s11 }
  0x35   : > { %v285_v28 = vadd.f32 %v284_v23, %v281_v22  ;;  %v292_v29 = vmul.f32 %v452_v6, %v291_v27  ;;  %v297_v30 = vstv %s462_s12 }
  0x36   : > { %275 = vst.msk [vmem:[%s244_s27] ss:$4 sm:$0x3] %vm795_vm0, %v270_v25  ;;  %v298_v31 = vmul.f32 %v297_v30, %v246_v0  ;;  %v300_v32 = vstv %s463_s21 }
  0x37   : > { %v289_v33 = vadd.f32 %v288_v26, %v285_v28  ;;  %v303_v34 = vstv %s464_s22 }
  0x38   : > { %v301_v35 = vadd.f32 %v300_v32, %v298_v31  ;;  %v304_v36 = vmul.f32 %v450_v3, %v303_v34  ;;  %v307_v37 = vstv %s465_s23 }
  0x39   : > { %v293_v38 = vadd.f32 %v292_v29, %v289_v33  ;;  %v308_v39 = vmul.f32 %v451_v4, %v307_v37  ;;  %v311_v40 = vstv %s466_s15 }
  0x3a   : > { %v305_v41 = vadd.f32 %v304_v36, %v301_v35  ;;  %v312_v42 = vmul.f32 %v452_v6, %v311_v40 }
  0x3b   : > { %461 = vst.msk [vmem:[%s244_s27 + $0x1] ss:$4 sm:$0x3] %vm795_vm0, %v293_v38 }
  0x3c   : > { %v309_v43 = vadd.f32 %v308_v39, %v305_v41 }
  0x3e   : > { %v313_v44 = vadd.f32 %v312_v42, %v309_v43 }
  0x40   : > { %467 = vst.msk [vmem:[%s244_s27 + $0x2] ss:$4 sm:$0x3] %vm795_vm0, %v313_v44 }
  0x41 PF: > { %s18_s17 = sadd.s32 1, %s666_s17   ;;  %s833_s12 = smov %s650_s13 }
  0x42   : > { %p15_p1 = scmp.ge.s32.totalorder %s18_s17, 4   ;;  %s834_s13 = smov %s654_s14 }
  0x43   : > { %s835_s14 = smov %s763_s10  ;;  %s836_s15 = smov %s662_s16 }
  0x44   : > { %s837_s16 = smov %s839_s30  ;;  %17 = sbr.rel (!%p15_p1) target bundleno = 6 (0x6), region = 87 }
  0x49   :  { %346 = vsyncpa [#allocation3], 1 }
  0x4a   :  { %348 = vsyncpa [#allocation3 + $0x1], 1 }
  0x4b   :  { %349 = vsyncpa [#allocation4], 1 }
  0x4c   :  { %351 = vsyncpa [#allocation4 + $0x1], 1 }
  0x4d   :  { %352 = vsyncpa [#allocation5], 1 }
  0x4e   :  { %354 = vsyncpa [#allocation5 + $0x1], 1 }

</bundles_post_ra>
